<compile_context>
chip_gen: v6e
topology: v6e:2x2x1
jax: 0.10.0
libtpu: 0.0.40
codegen_flags: <defaults>
</compile_context>

<pallas_src>
import functools
import math

import jax
import jax.numpy as jnp
from jax import lax
from jax.experimental import pallas as pl
from jax.experimental.pallas import tpu as pltpu

_LANES = 512            # lane-dense last dim (multiple of 128)
_MAX_BLOCK_ROWS = 512   # 512 x 512 x 4 B = 1 MiB per f32 tile


def _round_up(x, m):
    return ((x + m - 1) // m) * m


def _mix32(x):
    """lowbias32-style integer hash, uint32 -> uint32 (pure VPU ops)."""
    x = x ^ (x >> jnp.uint32(16))
    x = x * jnp.uint32(0x7FEB352D)
    x = x ^ (x >> jnp.uint32(15))
    x = x * jnp.uint32(0x846CA68B)
    x = x ^ (x >> jnp.uint32(16))
    return x


def _gaussian_noise_kernel(seed_ref, x_ref, o_ref, *, sigma):
    br, lw = x_ref.shape
    half = lw // 2
    assert half & (half - 1) == 0, "lane half-width must be a power of two"
    shift = half.bit_length() - 1

    # Two independent per-call keys derived from the seed (scalar-unit work).
    s = seed_ref[0].astype(jnp.uint32)
    key1 = _mix32(s ^ jnp.uint32(0x243F6A88))
    key2 = _mix32(s ^ jnp.uint32(0x85A308D3))

    # Global pair index: pair = global_row * half + col.  Depends only on the
    # element's global position, so results are tile-size independent.
    row0 = pl.program_id(0) * br
    row_ids = lax.broadcasted_iota(jnp.int32, (br, half), 0) + row0
    col_ids = lax.broadcasted_iota(jnp.int32, (br, half), 1)
    pair_idx = ((row_ids << shift) | col_ids).astype(jnp.uint32)
    # NOTE: 32-bit counters -> streams repeat past ~2^31 elements (fine for images).

    bits1 = _mix32(pair_idx ^ key1)
    bits2 = _mix32(pair_idx ^ key2)

    # bits -> uniform via exponent bitcast: v = 1 + mantissa/2^23 in [1, 2).
    one = jnp.uint32(0x3F800000)
    v1 = pltpu.bitcast((bits1 >> jnp.uint32(9)) | one, jnp.float32)
    v2 = pltpu.bitcast((bits2 >> jnp.uint32(9)) | one, jnp.float32)
    u1 = 2.0 - v1                        # (0, 1]  -> log(u1) is finite
    theta = (2.0 * math.pi) * (v2 - 1.0)  # [0, 2*pi)

    # Box-Muller; BOTH outputs used (one per lane half), sigma folded into r.
    r = jnp.float32(sigma) * jnp.sqrt(jnp.log(u1) * -2.0)
    n0 = r * jnp.cos(theta)
    n1 = r * jnp.sin(theta)

    xl = x_ref[:, :half].astype(jnp.float32)
    xr = x_ref[:, half:].astype(jnp.float32)
    o_ref[:, :half] = jnp.clip(xl + n0, 0.0, 1.0).astype(o_ref.dtype)
    o_ref[:, half:] = jnp.clip(xr + n1, 0.0, 1.0).astype(o_ref.dtype)


def gaussian_noise(img, sigma, seed):
    """Adds N(0, sigma) noise to `img` (float, values in [0,1]) and clips to [0, 1]."""
    orig_shape = img.shape
    total = img.size
    rows = (total + _LANES - 1) // _LANES
    padded_total = rows * _LANES

    flat = img.reshape(-1)
    if padded_total != total:
        # Ragged sizes only: pad by < _LANES elements to make the 2-D reshape legal.
        flat = jnp.pad(flat, (0, padded_total - total))
    flat2d = flat.reshape(rows, _LANES)

    if rows <= 8:
        block_rows = rows                       # single full-dim block (tiny input)
    else:
        # >= 2 blocks (v7x megacore + pipelining), rows per block a multiple of 8,
        # capped at _MAX_BLOCK_ROWS.  Pallas masks the partial final block.
        block_rows = min(_MAX_BLOCK_ROWS, _round_up((rows + 1) // 2, 8))
    n_blocks = (rows + block_rows - 1) // block_rows

    seed_arr = jnp.asarray([seed], dtype=jnp.int32)

    out = pl.pallas_call(
        functools.partial(_gaussian_noise_kernel, sigma=float(sigma)),
        out_shape=jax.ShapeDtypeStruct((rows, _LANES), flat2d.dtype),
        grid_spec=pltpu.PrefetchScalarGridSpec(
            num_scalar_prefetch=1,              # seed lands in SMEM
            grid=(n_blocks,),
            in_specs=[pl.BlockSpec((block_rows, _LANES), lambda i, seed: (i, 0))],
            out_specs=pl.BlockSpec((block_rows, _LANES), lambda i, seed: (i, 0)),
        ),
        compiler_params=pltpu.CompilerParams(
            dimension_semantics=("parallel",),   # independent blocks -> both TCs on v7x
            vmem_limit_bytes=32 * 1024 * 1024,   # headroom on v5e (default 16 MiB)
        ),
    )(seed_arr, flat2d)

    out = out.reshape(-1)
    if padded_total != total:
        out = out[:total]
    return out.reshape(orig_shape)


if __name__ == "__main__":
    key = jax.random.PRNGKey(0)
    # Small NCHW image, values in [0, 1] like a normalized image tensor.
    x = jax.random.uniform(key, (2, 4, 16, 16), dtype=jnp.float32)
    sigma = 0.1

    y = jax.block_until_ready(gaussian_noise(x, sigma=sigma, seed=1234))

    # Shape/dtype preserved, output clipped to [0, 1], noise actually applied.
    assert y.shape == x.shape and y.dtype == x.dtype
    assert bool(jnp.all(y >= 0.0)) and bool(jnp.all(y <= 1.0))
    assert bool(jnp.any(y != jnp.clip(x, 0.0, 1.0)))

    # Determinism: same seed -> identical output.
    y_rep = jax.block_until_ready(gaussian_noise(x, sigma=sigma, seed=1234))
    assert bool(jnp.all(y == y_rep))

    # Noise amplitude sanity check on interior pixels (clipping is rare there).
    interior = (x > 0.3) & (x < 0.7)
    diff = jnp.where(interior, y - x, 0.0)
    n = jnp.maximum(jnp.sum(interior), 1)
    est_std = float(jnp.sqrt(jnp.sum(diff * diff) / n))
    assert 0.5 * sigma < est_std < 1.5 * sigma, est_std

    # Ragged shape exercises the (small) pad-and-slice path.
    x2 = jax.random.uniform(jax.random.PRNGKey(1), (1, 3, 7, 9), dtype=jnp.float32)
    y2 = jax.block_until_ready(gaussian_noise(x2, sigma=0.05, seed=7))
    assert y2.shape == x2.shape
    assert bool(jnp.all(y2 >= 0.0)) and bool(jnp.all(y2 <= 1.0))

    # Larger input exercises the multi-block grid with a partial final block.
    x3 = jax.random.uniform(jax.random.PRNGKey(2), (3, 3, 64, 64), dtype=jnp.float32)
    s3 = 0.07
    y3 = jax.block_until_ready(gaussian_noise(x3, sigma=s3, seed=99))
    assert y3.shape == x3.shape
    assert bool(jnp.all(y3 >= 0.0)) and bool(jnp.all(y3 <= 1.0))
    interior3 = (x3 > 0.3) & (x3 < 0.7)
    diff3 = jnp.where(interior3, y3 - x3, 0.0)
    n3 = jnp.maximum(jnp.sum(interior3), 1)
    est_std3 = float(jnp.sqrt(jnp.sum(diff3 * diff3) / n3))
    assert 0.5 * s3 < est_std3 < 1.5 * s3, est_std3

    print("KERNEL_OK")
</pallas_src>

<mosaic_0001>
module attributes {stable_mosaic.version = 11 : i64} {
  func.func @_gaussian_noise_kernel(%arg0: i32, %arg1: memref<1xi32, #tpu.memory_space<smem>>, %arg2: memref<4x512xf32, #tpu.memory_space<vmem>>, %arg3: memref<4x512xf32, #tpu.memory_space<vmem>>) attributes {dimension_semantics = [#tpu.dimension_semantics<parallel>], iteration_bounds = array<i64: 1>, scalar_prefetch = 1 : i64, scratch_operands = 0 : i64, tpu.core_type = #tpu.core_type<tc>, window_params = [{transform_indices = @transform_0, window_bounds = array<i64: 4, 512>}, {transform_indices = @transform_1, window_bounds = array<i64: 4, 512>}]} {
    %c0 = arith.constant 0 : index
    %0 = memref.load %arg1[%c0] : memref<1xi32, #tpu.memory_space<smem>>
    %c608135816_i32 = arith.constant 608135816 : i32
    %1 = arith.xori %0, %c608135816_i32 : i32
    %c16_i32 = arith.constant 16 : i32
    %2 = arith.shrui %1, %c16_i32 : i32
    %3 = arith.xori %1, %2 : i32
    %c2146121005_i32 = arith.constant 2146121005 : i32
    %4 = arith.muli %3, %c2146121005_i32 : i32
    %c15_i32 = arith.constant 15 : i32
    %5 = arith.shrui %4, %c15_i32 : i32
    %6 = arith.xori %4, %5 : i32
    %c-2073254261_i32 = arith.constant -2073254261 : i32
    %7 = arith.muli %6, %c-2073254261_i32 : i32
    %c16_i32_0 = arith.constant 16 : i32
    %8 = arith.shrui %7, %c16_i32_0 : i32
    %9 = arith.xori %7, %8 : i32
    %c-2052912941_i32 = arith.constant -2052912941 : i32
    %10 = arith.xori %0, %c-2052912941_i32 : i32
    %c16_i32_1 = arith.constant 16 : i32
    %11 = arith.shrui %10, %c16_i32_1 : i32
    %12 = arith.xori %10, %11 : i32
    %c2146121005_i32_2 = arith.constant 2146121005 : i32
    %13 = arith.muli %12, %c2146121005_i32_2 : i32
    %c15_i32_3 = arith.constant 15 : i32
    %14 = arith.shrui %13, %c15_i32_3 : i32
    %15 = arith.xori %13, %14 : i32
    %c-2073254261_i32_4 = arith.constant -2073254261 : i32
    %16 = arith.muli %15, %c-2073254261_i32_4 : i32
    %c16_i32_5 = arith.constant 16 : i32
    %17 = arith.shrui %16, %c16_i32_5 : i32
    %18 = arith.xori %16, %17 : i32
    %c4_i32 = arith.constant 4 : i32
    %19 = arith.muli %arg0, %c4_i32 : i32
    %20 = tpu.iota {dimensions = array<i32: 0>} : vector<4x256xi32>
    %21 = vector.broadcast %19 : i32 to vector<4x256xi32>
    %22 = arith.addi %20, %21 : vector<4x256xi32>
    %23 = tpu.iota {dimensions = array<i32: 1>} : vector<4x256xi32>
    %c8_i32 = arith.constant 8 : i32
    %24 = vector.broadcast %c8_i32 : i32 to vector<4x256xi32>
    %25 = arith.shli %22, %24 : vector<4x256xi32>
    %26 = arith.ori %25, %23 : vector<4x256xi32>
    %27 = vector.broadcast %9 : i32 to vector<4x256xi32>
    %28 = arith.xori %26, %27 : vector<4x256xi32>
    %c16_i32_6 = arith.constant 16 : i32
    %29 = vector.broadcast %c16_i32_6 : i32 to vector<4x256xi32>
    %30 = arith.shrui %28, %29 : vector<4x256xi32>
    %31 = arith.xori %28, %30 : vector<4x256xi32>
    %c2146121005_i32_7 = arith.constant 2146121005 : i32
    %32 = vector.broadcast %c2146121005_i32_7 : i32 to vector<4x256xi32>
    %33 = arith.muli %31, %32 : vector<4x256xi32>
    %c15_i32_8 = arith.constant 15 : i32
    %34 = vector.broadcast %c15_i32_8 : i32 to vector<4x256xi32>
    %35 = arith.shrui %33, %34 : vector<4x256xi32>
    %36 = arith.xori %33, %35 : vector<4x256xi32>
    %c-2073254261_i32_9 = arith.constant -2073254261 : i32
    %37 = vector.broadcast %c-2073254261_i32_9 : i32 to vector<4x256xi32>
    %38 = arith.muli %36, %37 : vector<4x256xi32>
    %c16_i32_10 = arith.constant 16 : i32
    %39 = vector.broadcast %c16_i32_10 : i32 to vector<4x256xi32>
    %40 = arith.shrui %38, %39 : vector<4x256xi32>
    %41 = arith.xori %38, %40 : vector<4x256xi32>
    %42 = vector.broadcast %18 : i32 to vector<4x256xi32>
    %43 = arith.xori %26, %42 : vector<4x256xi32>
    %c16_i32_11 = arith.constant 16 : i32
    %44 = vector.broadcast %c16_i32_11 : i32 to vector<4x256xi32>
    %45 = arith.shrui %43, %44 : vector<4x256xi32>
    %46 = arith.xori %43, %45 : vector<4x256xi32>
    %c2146121005_i32_12 = arith.constant 2146121005 : i32
    %47 = vector.broadcast %c2146121005_i32_12 : i32 to vector<4x256xi32>
    %48 = arith.muli %46, %47 : vector<4x256xi32>
    %c15_i32_13 = arith.constant 15 : i32
    %49 = vector.broadcast %c15_i32_13 : i32 to vector<4x256xi32>
    %50 = arith.shrui %48, %49 : vector<4x256xi32>
    %51 = arith.xori %48, %50 : vector<4x256xi32>
    %c-2073254261_i32_14 = arith.constant -2073254261 : i32
    %52 = vector.broadcast %c-2073254261_i32_14 : i32 to vector<4x256xi32>
    %53 = arith.muli %51, %52 : vector<4x256xi32>
    %c16_i32_15 = arith.constant 16 : i32
    %54 = vector.broadcast %c16_i32_15 : i32 to vector<4x256xi32>
    %55 = arith.shrui %53, %54 : vector<4x256xi32>
    %56 = arith.xori %53, %55 : vector<4x256xi32>
    %c9_i32 = arith.constant 9 : i32
    %57 = vector.broadcast %c9_i32 : i32 to vector<4x256xi32>
    %58 = arith.shrui %41, %57 : vector<4x256xi32>
    %c1065353216_i32 = arith.constant 1065353216 : i32
    %59 = vector.broadcast %c1065353216_i32 : i32 to vector<4x256xi32>
    %60 = arith.ori %58, %59 : vector<4x256xi32>
    %61 = tpu.bitcast %60 : vector<4x256xi32> -> vector<4x256xf32>
    %c9_i32_16 = arith.constant 9 : i32
    %62 = vector.broadcast %c9_i32_16 : i32 to vector<4x256xi32>
    %63 = arith.shrui %56, %62 : vector<4x256xi32>
    %c1065353216_i32_17 = arith.constant 1065353216 : i32
    %64 = vector.broadcast %c1065353216_i32_17 : i32 to vector<4x256xi32>
    %65 = arith.ori %63, %64 : vector<4x256xi32>
    %66 = tpu.bitcast %65 : vector<4x256xi32> -> vector<4x256xf32>
    %cst = arith.constant 2.000000e+00 : f32
    %67 = vector.broadcast %cst : f32 to vector<4x256xf32>
    %68 = arith.subf %67, %61 : vector<4x256xf32>
    %cst_18 = arith.constant 1.000000e+00 : f32
    %69 = vector.broadcast %cst_18 : f32 to vector<4x256xf32>
    %70 = arith.subf %66, %69 : vector<4x256xf32>
    %cst_19 = arith.constant 6.28318548 : f32
    %71 = vector.broadcast %cst_19 : f32 to vector<4x256xf32>
    %72 = arith.mulf %71, %70 : vector<4x256xf32>
    %73 = math.log %68 : vector<4x256xf32>
    %cst_20 = arith.constant -2.000000e+00 : f32
    %74 = vector.broadcast %cst_20 : f32 to vector<4x256xf32>
    %75 = arith.mulf %73, %74 : vector<4x256xf32>
    %76 = math.sqrt %75 : vector<4x256xf32>
    %cst_21 = arith.constant 1.000000e-01 : f32
    %77 = vector.broadcast %cst_21 : f32 to vector<4x256xf32>
    %78 = arith.mulf %77, %76 : vector<4x256xf32>
    %79 = math.cos %72 : vector<4x256xf32>
    %80 = arith.mulf %78, %79 : vector<4x256xf32>
    %81 = math.sin %72 : vector<4x256xf32>
    %82 = arith.mulf %78, %81 : vector<4x256xf32>
    %c0_22 = arith.constant 0 : index
    %c0_23 = arith.constant 0 : index
    %83 = vector.load %arg2[%c0_22, %c0_23] : memref<4x512xf32, #tpu.memory_space<vmem>>, vector<4x256xf32>
    %c0_24 = arith.constant 0 : index
    %c256 = arith.constant 256 : index
    %84 = vector.load %arg2[%c0_24, %c256] : memref<4x512xf32, #tpu.memory_space<vmem>>, vector<4x256xf32>
    %85 = arith.addf %83, %80 : vector<4x256xf32>
    %cst_25 = arith.constant 0.000000e+00 : f32
    %cst_26 = arith.constant 1.000000e+00 : f32
    %86 = vector.broadcast %cst_25 : f32 to vector<4x256xf32>
    %87 = arith.maximumf %86, %85 : vector<4x256xf32>
    %88 = vector.broadcast %cst_26 : f32 to vector<4x256xf32>
    %89 = arith.minimumf %88, %87 : vector<4x256xf32>
    %c0_27 = arith.constant 0 : index
    %c0_28 = arith.constant 0 : index
    %90 = vector.load %arg3[%c0_27, %c0_28] : memref<4x512xf32, #tpu.memory_space<vmem>>, vector<4x256xf32>
    tpu.vector_store %arg3[%c0_27, %c0_28], %89 {strides = array<i32>} : memref<4x512xf32, #tpu.memory_space<vmem>>, vector<4x256xf32>,
    %91 = arith.addf %84, %82 : vector<4x256xf32>
    %cst_29 = arith.constant 0.000000e+00 : f32
    %cst_30 = arith.constant 1.000000e+00 : f32
    %92 = vector.broadcast %cst_29 : f32 to vector<4x256xf32>
    %93 = arith.maximumf %92, %91 : vector<4x256xf32>
    %94 = vector.broadcast %cst_30 : f32 to vector<4x256xf32>
    %95 = arith.minimumf %94, %93 : vector<4x256xf32>
    %c0_31 = arith.constant 0 : index
    %c256_32 = arith.constant 256 : index
    %96 = vector.load %arg3[%c0_31, %c256_32] : memref<4x512xf32, #tpu.memory_space<vmem>>, vector<4x256xf32>
    tpu.vector_store %arg3[%c0_31, %c256_32], %95 {strides = array<i32>} : memref<4x512xf32, #tpu.memory_space<vmem>>, vector<4x256xf32>,
    return
  }
  func.func @transform_0(%arg0: i32, %arg1: memref<1xi32, #tpu.memory_space<smem>>) -> (i32, i32) {
    %c0_i32 = arith.constant 0 : i32
    %c0_i32_0 = arith.constant 0 : i32
    return %arg0, %c0_i32 : i32, i32
  }
  func.func @transform_1(%arg0: i32, %arg1: memref<1xi32, #tpu.memory_space<smem>>) -> (i32, i32) {
    %c0_i32 = arith.constant 0 : i32
    %c0_i32_0 = arith.constant 0 : i32
    return %arg0, %c0_i32 : i32, i32
  }
}

</mosaic_0001>

<bundles_post_ra>
// kernel: tpu_custom_call.1
= control target key start
LH: loop header
LB: loop body
LE: loop exit
PB: predicated region body
PF: predicated region fallthrough
CT: control target
= control target key end

     0   :  { %8 = vsyncpa [#allocation5], 0  ;;  %s812_s0 = inlined_call_operand.<no memory space> [shape: s32[1], index: 0, kind: input, shape index: {}]   ;;  %s813_s1 = inlined_call_operand.hbm [shape: f32[4,512], index: 1, kind: input, shape index: {}]   ;;  %s814_s2 = inlined_call_operand.hbm [shape: f32[4,512], index: 2, kind: output, shape index: {}]  }
   0x1   :  { %9 = vsyncpa [#allocation6], 0  ;;  %s676_s9 = smov [#allocation4]  }
   0x2   :  { %s16_s10 = sshll.u32 %s676_s9, 4  ;;  %s17_s10 = int_to_ptr.vmem [resolvable:$true] %s16_s10 }
   0x3   :  { %s640_s11 = scalar_lea.vmem %s17_s10, 256  ;;  %p645_p1 = scmp.lt.s32.totalorder %s17_s10, %s17_s10 }
   0x4   :  { %p641_p0 = scmp.ne.s32.totalorder %s17_s10, %s640_s11  ;;  %p646_p2 = scmp.lt.s32.totalorder %s640_s11, %s640_s11 }
   0x6   :  { %p647_p3 = por %p646_p2, %p645_p1 }
   0x8   :  { %p648_p4 = pnand %p647_p3, %p641_p0 }
   0xa   :  { %651 = shalt.err (!%p648_p4)
}
   0xb   :  { %19 = dma.hbm_to_vmem [thread:$0]  %s813_s1, 256, %s17_s10, [#allocation5]  }
   0xc   :  { %672 = dma.done.wait [#allocation5], 256  }
   0xd   :  { %673 = vsyncadd [#allocation5], 4294967040  ;;  %s24_s16 = sxor.u32 608135816, %s812_s0  ;;  %s33_s19 = sxor.u32 2242054355, %s812_s0  ;;  %v43_v0 = vlaneseq }
   0xe   :  { %s25_s20 = sshrl.u32 %s24_s16, 16  ;;  %s34_s21 = sshrl.u32 %s33_s19, 16  ;;  %v677_v63 = vmov 683565275  }
   0xf   :  { %s26_s22 = sxor.u32 %s25_s20, %s24_s16  ;;  %s35_s23 = sxor.u32 %s34_s21, %s33_s19  ;;  %v44_v1 = vshrl.u32 %v43_v0, 7  ;;  %v48_v2 = vand.u32 127, %v43_v0 }
  0x10   :  { %s27_s24 = smul.u32 2146121005, %s26_s22  ;;  %s683_s6 = smov [#allocation7]  }
  0x11   :  { %s36_s25 = smul.u32 2146121005, %s35_s23  ;;  %v49_v3 = vadd.s32 128, %v48_v2  ;;  %v50_v4 = vshll.u32 %v44_v1, 8  ;;  %v678_v1 = vmov 2475754826  }
  0x12   :  { %s28_s1 = sshrl.u32 %s27_s24, 15  ;;  %s573_s7 = sshll.u32 %s683_s6, 4  ;;  %s574_s7 = int_to_ptr.vmem [resolvable:$true] %s573_s7 }
  0x13   :  { %s37_s26 = sshrl.u32 %s36_s25, 15  ;;  %s29_s27 = sxor.u32 %s28_s1, %s27_s24  ;;  %v51_v5 = vor.u32 %v50_v4, %v48_v2  ;;  %v52_v6 = vor.u32 %v50_v4, %v49_v3 }
  0x14   :  { %s38_s28 = sxor.u32 %s37_s26, %s36_s25  ;;  %s30_s30 = smul.u32 2221713035, %s29_s27 }
  0x15   :  { %s39_s29 = smul.u32 2221713035, %s38_s28  ;;  %s652_s8 = scalar_lea.vmem %s574_s7, 256 }
  0x16   :  { %s31_s4 = sshrl.u32 %s30_s30, 16  ;;  %p653_p5 = scmp.ne.s32.totalorder %s574_s7, %s652_s8 }
  0x17   :  { %s40_s0 = sshrl.u32 %s39_s29, 16  ;;  %s32_s5 = sxor.u32 %s31_s4, %s30_s30 }
  0x18   :  { %s41_s3 = sxor.u32 %s40_s0, %s39_s29  ;;  %v53_v16 = vstv %s32_s5  ;;  %p657_p6 = scmp.lt.s32.totalorder %s574_s7, %s574_s7 }
  0x19   :  { %v72_v7 = vstv %s41_s3  ;;  %v54_v19 = vxor.u32 %v53_v16, %v51_v5  ;;  %v55_v24 = vxor.u32 %v53_v16, %v52_v6  ;;  %v681_v16 = vmov 920167782   ;;  %p658_p7 = scmp.lt.s32.totalorder %s652_s8, %s652_s8 }
  0x1a   :  { %v73_v8 = vxor.u32 %v72_v7, %v51_v5  ;;  %v74_v9 = vxor.u32 %v72_v7, %v52_v6 }
  0x1b   :  { %v56_v25 = vshrl.u32 %v54_v19, 16  ;;  %v57_v30 = vshrl.u32 %v55_v24, 16  ;;  %p659_p8 = por %p658_p7, %p657_p6 }
  0x1c   :  { %v75_v10 = vshrl.u32 %v73_v8, 16  ;;  %v76_v11 = vshrl.u32 %v74_v9, 16 }
  0x1d   :  { %v58_v31 = vxor.u32 %v56_v25, %v54_v19  ;;  %v59_v36 = vxor.u32 %v57_v30, %v55_v24  ;;  %p660_p9 = pnand %p659_p8, %p653_p5 }
  0x1e   :  { %v77_v12 = vxor.u32 %v75_v10, %v73_v8  ;;  %v78_v13 = vxor.u32 %v76_v11, %v74_v9  ;;  %v679_v8 = vmov 2131351028  }
  0x1f   :  { %v60_v37 = vmul.u32 2146121005, %v58_v31  ;;  %v61_v42 = vmul.u32 2146121005, %v59_v36 }
  0x20   :  { %v79_v14 = vmul.u32 2146121005, %v77_v12  ;;  %v80_v15 = vmul.u32 2146121005, %v78_v13  ;;  %v680_v12 = vmov 2102212464  }
  0x21   :  { %v62_v43 = vshrl.u32 %v60_v37, 15  ;;  %v63_v47 = vshrl.u32 %v61_v42, 15 }
  0x22   :  { %v81_v17 = vshrl.u32 %v79_v14, 15  ;;  %v82_v18 = vshrl.u32 %v80_v15, 15 }
  0x23   :  { %v64_v49 = vxor.u32 %v62_v43, %v60_v37  ;;  %v715_v54 = vxor.u32 %v63_v47, %v61_v42 }
  0x24   :  { %v83_v20 = vxor.u32 %v81_v17, %v79_v14  ;;  %v84_v21 = vxor.u32 %v82_v18, %v80_v15 }
  0x25   :  { %v66_v56 = vmul.u32 2221713035, %v64_v49  ;;  %v67_v60 = vmul.u32 2221713035, %v715_v54 }
  0x26   :  { %v85_v22 = vmul.u32 2221713035, %v83_v20  ;;  %v86_v23 = vmul.u32 2221713035, %v84_v21 }
  0x27   :  { %v68_v61 = vshrl.u32 %v66_v56, 16  ;;  %v69_v10 = vshrl.u32 %v67_v60, 16 }
  0x28   :  { %v87_v26 = vshrl.u32 %v85_v22, 16  ;;  %v88_v27 = vshrl.u32 %v86_v23, 16 }
  0x29   :  { %v724_v14 = vxor.u32 %v68_v61, %v66_v56  ;;  %v71_v61 = vxor.u32 %v69_v10, %v67_v60 }
  0x2a   :  { %v89_v28 = vxor.u32 %v87_v26, %v85_v22  ;;  %v90_v29 = vxor.u32 %v88_v27, %v86_v23  ;;  %v682_v23 = vmov 1326507024  }
  0x2c   :  { %v97_v32 = vshrl.u32 %v89_v28, 9  ;;  %v98_v33 = vshrl.u32 %v90_v29, 9 }
  0x2e   :  { %v99_v34 = vor.u32 1065353216, %v97_v32  ;;  %v100_v35 = vor.u32 1065353216, %v98_v33 }
  0x30   :  { %v582_v38 = vadd.f32 -1.0, %v99_v34  ;;  %v583_v39 = vadd.f32 -1.0, %v100_v35 }
  0x32   :  { %v708_v40 = vmul.f32 6.2831855, %v582_v38  ;;  %v710_v41 = vmul.f32 6.2831855, %v583_v39 }
  0x34   :  { %v134_v44 = vand.u32 2139095040, %v708_v40  ;;  %v237_v45 = vand.u32 2139095040, %v710_v41  ;;  %v131_v52 = vand.u32 2147483647, %v708_v40  ;;  %v234_v3 = vand.u32 2147483647, %v710_v41 }
  0x35   :  { %vm133_vm14 = vcmp.lt.s32.totalorder %v708_v40, 0 }
  0x36   :  { %v135_v46 = vshrl.u32 %v134_v44, 23  ;;  %v238_v48 = vshrl.u32 %v237_v45, 23  ;;  %v138_v58 = vand.u32 8388607, %v131_v52  ;;  %v241_v26 = vand.u32 8388607, %v234_v3 }
  0x37   :  { %vm770_vm13 = vcmp.le.f32.partialorder %v131_v52, 0.7853982 }
  0x38   :  { %v584_v50 = vadd.s32 4294967169, %v135_v46  ;;  %v588_v51 = vadd.s32 4294967169, %v238_v48  ;;  %v139_v5 = vor.u32 8388608, %v138_v58 }
  0x3a   :  { %v141_v53 = vadd.s32 1, %v584_v50  ;;  %v244_v55 = vadd.s32 1, %v588_v51  ;;  %v179_v25 = vshll.u32 %v139_v5, 8 }
  0x3c   :  { %vm142_vm0 = vcmp.gt.s32.totalorder %v141_v53, 0  ;;  %vm245_vm1 = vcmp.gt.s32.totalorder %v244_v55, 0 }
  0x3d   :  { %v143_v57 = vsel %vm142_vm0, %v141_v53, 0  ;;  %v246_v4 = vsel %vm245_vm1, %v244_v55, 0  ;;  %vm236_vm0 = vcmp.lt.s32.totalorder %v710_v41, 0  ;;  %vm235_vm1 = vcmp.le.f32.partialorder %v234_v3, 0.7853982 }
  0x3e   :  { %v145_v59 = vand.u32 31, %v143_v57  ;;  %v144_v6 = vshrl.u32 %v143_v57, 5  ;;  %v248_v18 = vand.u32 31, %v246_v4  ;;  %v247_v39 = vshrl.u32 %v246_v4, 5 }
  0x3f   :  { %v91_v4 = vshrl.u32 %v724_v14, 9 }
  0x40   :  { %v146_v62 = vsub.s32 32, %v145_v59  ;;  %v148_v0 = vshll.u32 %v677_v63, %v145_v59  ;;  %v151_v2 = vshll.u32 %v678_v1, %v145_v59  ;;  %v154_v11 = vshll.u32 %v679_v8, %v145_v59 }
  0x41   :  { %v157_v13 = vshll.u32 %v680_v12, %v145_v59  ;;  %v160_v17 = vshll.u32 %v681_v16, %v145_v59  ;;  %vm163_vm2 = vcmp.lt.s32.totalorder %v144_v6, 1  ;;  %vm165_vm3 = vcmp.lt.s32.totalorder %v144_v6, 3 }
  0x42   :  { %v149_v7 = vshrl.u32 %v678_v1, %v146_v62  ;;  %v152_v9 = vshrl.u32 %v679_v8, %v146_v62  ;;  %v147_v15 = vshrl.u32 %v677_v63, %v146_v62  ;;  %v155_v21 = vshrl.u32 %v680_v12, %v146_v62 }
  0x43   :  { %v158_v22 = vshrl.u32 %v681_v16, %v146_v62  ;;  %v161_v24 = vshrl.u32 %v682_v23, %v146_v62  ;;  %vm166_vm4 = vcmp.lt.s32.totalorder %v144_v6, 4  ;;  %vm164_vm5 = vcmp.lt.s32.totalorder %v144_v6, 2 }
  0x44   :  { %v150_v19 = vor.u32 %v149_v7, %v148_v0  ;;  %v153_v20 = vor.u32 %v152_v9, %v151_v2  ;;  %v156_v27 = vor.u32 %v155_v21, %v154_v11  ;;  %v249_v35 = vsub.s32 32, %v248_v18 }
  0x45   :  { %v159_v28 = vor.u32 %v158_v22, %v157_v13  ;;  %v162_v29 = vor.u32 %v161_v24, %v160_v17  ;;  %v251_v44 = vshll.u32 %v677_v63, %v248_v18  ;;  %v254_v45 = vshll.u32 %v678_v1, %v248_v18 }
  0x46   :  { %v167_v30 = vsel %vm163_vm2, %v147_v15, %v150_v19  ;;  %v171_v31 = vsel %vm163_vm2, %v150_v19, %v153_v20  ;;  %v168_v32 = vsel %vm166_vm4, %v156_v27, 2102212464  ;;  %v175_v34 = vsel %vm163_vm2, %v153_v20, %v156_v27 }
  0x47   :  { %v172_v33 = vsel %vm166_vm4, %v159_v28, 920167782  ;;  %v169_v36 = vsel %vm165_vm3, %v153_v20, %v168_v32  ;;  %v176_v38 = vsel %vm166_vm4, %v162_v29, 1326507024  ;;  %v252_v53 = vshrl.u32 %v678_v1, %v249_v35 }
  0x48   :  { %v173_v37 = vsel %vm165_vm3, %v156_v27, %v172_v33  ;;  %v177_v43 = vsel %vm165_vm3, %v159_v28, %v176_v38  ;;  %v170_v46 = vsel %vm164_vm5, %v167_v30, %v169_v36  ;;  %v255_v55 = vshrl.u32 %v679_v8, %v249_v35 }
  0x49   :  { %v174_v42 = vsel %vm164_vm5, %v171_v31, %v173_v37  ;;  %v178_v47 = vsel %vm164_vm5, %v175_v34, %v177_v43  ;;  %v257_v56 = vshll.u32 %v679_v8, %v248_v18  ;;  %v258_v57 = vshrl.u32 %v680_v12, %v249_v35 }
  0x4a   :  { %v733_v48 = vmul.u32.u64.low %v179_v25, %v174_v42  ;;  %v734_v49 = vmul.u32.u64.high %v179_v25, %v174_v42, %v733_v48  ;;  %v737_v50 = vmul.u32.u64.low %v179_v25, %v178_v47  ;;  %v738_v51 = vmul.u32.u64.high %v179_v25, %v178_v47, %v737_v50 }
  0x4b   :  { %v260_v58 = vshll.u32 %v680_v12, %v248_v18  ;;  %v261_v59 = vshrl.u32 %v681_v16, %v249_v35  ;;  %v186_v62 = vmul.u32 %v179_v25, %v170_v46  ;;  %v263_v0 = vshll.u32 %v681_v16, %v248_v18 }
  0x4c   :  { %v264_v2 = vshrl.u32 %v682_v23, %v249_v35  ;;  %v189_v5 = vadd.s32 1, %v734_v49  ;;  %v242_v6 = vor.u32 8388608, %v241_v26  ;;  %v250_v7 = vshrl.u32 %v677_v63, %v249_v35 }
  0x4d   :  { %vm188_vm6 = vc.u32 %v738_v51, %v733_v48  ;;  %v253_v1 = vor.u32 %v252_v53, %v251_v44  ;;  %v256_v8 = vor.u32 %v255_v55, %v254_v45  ;;  %vm266_vm7 = vcmp.lt.s32.totalorder %v247_v39, 1 }
  0x4e   :  { %v190_v9 = vsel %vm188_vm6, %v189_v5, %v734_v49  ;;  %v259_v54 = vor.u32 %v258_v57, %v257_v56  ;;  %v262_v60 = vor.u32 %v261_v59, %v260_v58  ;;  %v265_v10 = vor.u32 %v264_v2, %v263_v0 }
  0x4f   :  { %v191_v11 = vadd.s32 %v190_v9, %v186_v62  ;;  %vm269_vm8 = vcmp.lt.s32.totalorder %v247_v39, 4  ;;  %v92_v12 = vshrl.u32 %v71_v61, 9  ;;  %v93_v13 = vor.u32 1065353216, %v91_v4 }
  0x50   :  { %vm268_vm9 = vcmp.lt.s32.totalorder %v247_v39, 3  ;;  %v271_v14 = vsel %vm269_vm8, %v259_v54, 2102212464  ;;  %vm267_vm10 = vcmp.lt.s32.totalorder %v247_v39, 2  ;;  %v274_v63 = vsel %vm266_vm7, %v253_v1, %v256_v8 }
  0x51   :  { %v192_v15 = vadd.s32 536870912, %v191_v11  ;;  %v282_v16 = vshll.u32 %v242_v6, 8  ;;  %v270_v17 = vsel %vm266_vm7, %v250_v7, %v253_v1  ;;  %v275_v18 = vsel %vm269_vm8, %v262_v60, 920167782 }
  0x52   :  { %v278_v19 = vsel %vm266_vm7, %v256_v8, %v259_v54  ;;  %v279_v20 = vsel %vm269_vm8, %v265_v10, 1326507024  ;;  %v272_v22 = vsel %vm268_vm9, %v256_v8, %v271_v14  ;;  %v276_v23 = vsel %vm268_vm9, %v259_v54, %v275_v18 }
  0x53   :  { %v751_v21 = vshrl.u32 %v192_v15, 30  ;;  %v280_v24 = vsel %vm268_vm9, %v262_v60, %v279_v20  ;;  %v94_v25 = vor.u32 1065353216, %v92_v12  ;;  %v277_v26 = vsel %vm267_vm10, %v274_v63, %v276_v23 }
  0x54   :  { %v281_v27 = vsel %vm267_vm10, %v278_v19, %v280_v24  ;;  %v273_v31 = vsel %vm267_vm10, %v270_v17, %v272_v22  ;;  %v760_v32 = vmul.u32.u64.low %v282_v16, %v277_v26  ;;  %v761_v33 = vmul.u32.u64.high %v282_v16, %v277_v26, %v760_v32 }
  0x55   :  { %v194_v28 = vshll.u32 %v751_v21, 30  ;;  %v756_v29 = vmul.u32.u64.low %v282_v16, %v281_v27  ;;  %v757_v30 = vmul.u32.u64.high %v282_v16, %v281_v27, %v756_v29  ;;  %v103_v34 = vsub.f32 2.0, %v93_v13 }
  0x56   :  { %v104_v36 = vsub.f32 2.0, %v94_v25  ;;  %v289_v38 = vmul.u32 %v282_v16, %v273_v31  ;;  %v292_v42 = vadd.s32 1, %v761_v33  ;;  %v187_v49 = vadd.s32 %v733_v48, %v738_v51 }
  0x57   :  { %v195_v35 = vsub.s32 %v191_v11, %v194_v28  ;;  %vm291_vm11 = vc.u32 %v757_v30, %v760_v32  ;;  %616 = vlog2.f32 %v103_v34  ;;  %v290_v14 = vadd.s32 %v760_v32, %v757_v30 }
  0x58   :  { %618 = vlog2.f32 %v104_v36  ;;  %v293_v44 = vsel %vm291_vm11, %v292_v42, %v761_v33  ;;  %v217_v23 = vsub.s32 4, %v751_v21 }
  0x59   :  { %v197_v37 = vsub.s32 0, %v195_v35  ;;  %v294_v39 = vadd.s32 %v293_v44, %v289_v38 }
  0x5a   :  { %v218_v28 = vsel %vm133_vm14, %v217_v23, %v751_v21 }
  0x5b   :  { %v585_v43 = vmin.u32 %v197_v37, %v195_v35  ;;  %v295_v47 = vadd.s32 536870912, %v294_v39  ;;  %v220_v32 = vsel %vm770_vm13, 0, %v218_v28 }
  0x5c   :  { %v432_v36 = vadd.s32 3, %v220_v32 }
  0x5d   :  { %v199_v45 = vclz %v585_v43  ;;  %v296_v50 = vshrl.u32 %v295_v47, 30 }
  0x5f   :  { %v586_v46 = vadd.s32 4294967294, %v199_v45  ;;  %v297_v58 = vshll.u32 %v296_v50, 30  ;;  %v320_v31 = vsub.s32 4, %v296_v50  ;;  %v224_v45 = vand.u32 3, %v220_v32 }
  0x61   :  { %vm587_vm12 = vcmp.lt.s32.totalorder %v586_v46, 0  ;;  %v298_v62 = vsub.s32 %v294_v39, %v297_v58  ;;  %v433_v39 = vand.u32 3, %v432_v36  ;;  %vm226_vm3 = vcmp.eq.s32.totalorder %v224_v45, 0 }
  0x62   :  { %v202_v53 = vsel %vm587_vm12, 0, %v586_v46  ;;  %vm229_vm4 = vcmp.eq.s32.totalorder %v224_v45, 2  ;;  %vm225_vm9 = vcmp.lt.s32.totalorder %v224_v45, 2  ;;  %vm223_vm12 = vweird.f32 %v708_v40 }
  0x63   :  { %v203_v55 = vsub.s32 32, %v202_v53  ;;  %v204_v56 = vshll.u32 %v195_v35, %v202_v53  ;;  %v207_v57 = vsub.s32 4294967266, %v202_v53  ;;  %v300_v4 = vsub.s32 0, %v298_v62 }
  0x64   :  { %v617_v5 = vpop.eup %616  ;;  %v321_v35 = vsel %vm236_vm0, %v320_v31, %v296_v50  ;;  %vm435_vm5 = vcmp.eq.s32.totalorder %v433_v39, 0  ;;  %vm438_vm6 = vcmp.eq.s32.totalorder %v433_v39, 2  ;;  %vm434_vm10 = vcmp.lt.s32.totalorder %v433_v39, 2 }
  0x65   :  { %v205_v59 = vshrl.u32 %v187_v49, %v203_v55  ;;  %v208_v61 = vadd.s32 127, %v207_v57  ;;  %v619_v6 = vpop.eup %618  ;;  %v589_v8 = vmin.u32 %v300_v4, %v298_v62  ;;  %v110_v9 = vmul.f32 0.6931472, %v617_v5 }
  0x66   :  { %v112_v54 = vmul.f32 0.6931472, %v619_v6  ;;  %v323_v43 = vsel %vm235_vm1, 0, %v321_v35 }
  0x67   :  { %v206_v0 = vor.u32 %v205_v59, %v204_v56  ;;  %v209_v2 = vshll.u32 %v208_v61, 23  ;;  %v302_v51 = vclz %v589_v8  ;;  %v775_v12 = vmul.f32 -2.0, %v110_v9 }
  0x68   :  { %v778_v15 = vmul.f32 -2.0, %v112_v54  ;;  %v536_v3 = vadd.s32 3, %v323_v43  ;;  %v327_v57 = vand.u32 3, %v323_v43 }
  0x69   :  { %v210_v7 = vor.u32 4788187, %v209_v2  ;;  %v213_v1 = vcvt.s32.f32 %v206_v0  ;;  %v590_v10 = vadd.s32 4294967294, %v302_v51  ;;  %620 = vrsqrt.f32 %v775_v12 }
  0x6a   :  { %622 = vrsqrt.f32 %v778_v15  ;;  %vm117_vm2 = vcmp.eq.f32.partialorder %v775_v12, inf  ;;  %v120_v47 = vand.u32 2147483648, %v775_v12  ;;  %vm119_vm7 = vcmp.eq.f32.partialorder %v775_v12, 0.0 }
  0x6b   :  { %v211_v48 = vand.u32 2147483647, %v210_v7  ;;  %vm591_vm15 = vcmp.lt.s32.totalorder %v590_v10, 0  ;;  %vm124_vm8 = vcmp.eq.f32.partialorder %v778_v15, inf  ;;  %v127_v56 = vand.u32 2147483648, %v778_v15 }
  0x6c   :  { %v305_v63 = vsel %vm591_vm15, 0, %v590_v10  ;;  %v537_v58 = vand.u32 3, %v536_v3  ;;  %vm126_vm11 = vcmp.eq.f32.partialorder %v778_v15, 0.0  ;;  %vm328_vm15 = vcmp.lt.s32.totalorder %v327_v57, 2 }
  0x6d   :  { %v214_v60 = vmul.f32 %v213_v1, %v211_v48  ;;  %v306_v17 = vsub.s32 32, %v305_v63  ;;  %v307_v18 = vshll.u32 %v298_v62, %v305_v63  ;;  %v310_v52 = vsub.s32 4294967266, %v305_v63 }
  0x6f   :  { %v215_v13 = vxor.u32 2147483648, %v214_v60  ;;  %v308_v20 = vshrl.u32 %v290_v14, %v306_v17  ;;  %v311_v22 = vadd.s32 127, %v310_v52 }
  0x71   :  { %v216_v16 = vsel %vm133_vm14, %v215_v13, %v214_v60  ;;  %v309_v24 = vor.u32 %v308_v20, %v307_v18  ;;  %v312_v25 = vshll.u32 %v311_v22, 23  ;;  %vm542_vm14 = vcmp.eq.s32.totalorder %v537_v58, 2  ;;  %v549_v20 = vld [vmem:[#allocation4] sm:$0xff]  ;;  %v550_v22 = vld [vmem:[#allocation4 + $0x8] sm:$0xff] }
  0x72   :  { %v219_v19 = vsel %vm770_vm13, %v708_v40, %v216_v16  ;;  %vm332_vm13 = vcmp.eq.s32.totalorder %v327_v57, 2 }
  0x73   :  { %624 = vcosq.f32 %v219_v19  ;;  %v313_v26 = vor.u32 4788187, %v312_v25  ;;  %v316_v27 = vcvt.s32.f32 %v309_v24 }
  0x74   :  { %626 = vsinq.f32 %v219_v19 }
  0x75   :  { %v314_v29 = vand.u32 2147483647, %v313_v26 }
  0x76   :  { %v621_v37 = vpop.eup %620 }
  0x77   :  { %v317_v30 = vmul.f32 %v316_v27, %v314_v29  ;;  %v623_v42 = vpop.eup %622  ;;  %v116_v46 = vmul.f32 %v621_v37, %v775_v12 }
  0x78   :  { %v123_v49 = vmul.f32 %v623_v42, %v778_v15 }
  0x79   :  { %v318_v33 = vxor.u32 2147483648, %v317_v30  ;;  %v118_v55 = vsel %vm117_vm2, %v775_v12, %v116_v46  ;;  %vm538_vm2 = vcmp.lt.s32.totalorder %v537_v58, 2 }
  0x7a   :  { %v121_v2 = vsel %vm119_vm7, %v120_v47, %v118_v55  ;;  %v125_v4 = vsel %vm124_vm8, %v778_v15, %v123_v49 }
  0x7b   :  { %v319_v34 = vsel %vm236_vm0, %v318_v33, %v317_v30  ;;  %v128_v1 = vsel %vm126_vm11, %v127_v56, %v125_v4  ;;  %v129_v8 = vmul.f32 0.1, %v121_v2  ;;  %vm329_vm0 = vcmp.eq.s32.totalorder %v327_v57, 0 }
  0x7c   :  { %v322_v38 = vsel %vm235_vm1, %v710_v41, %v319_v34  ;;  %vm539_vm1 = vcmp.eq.s32.totalorder %v537_v58, 0  ;;  %v130_v10 = vmul.f32 0.1, %v128_v1 }
  0x7d   :  { %628 = vcosq.f32 %v322_v38 }
  0x7e   :  { %630 = vsinq.f32 %v322_v38 }
  0x80   :  { %v625_v21 = vpop.eup %624 }
  0x81   :  { %v627_v44 = vpop.eup %626  ;;  %v230_v53 = vxor.u32 2147483648, %v625_v21 }
  0x82   :  { %v227_v50 = vxor.u32 2147483648, %v627_v44 }
  0x83   :  { %v231_v61 = vsel %vm229_vm4, %v230_v53, %v627_v44  ;;  %v440_v0 = vsel %vm438_vm6, %v230_v53, %v627_v44 }
  0x84   :  { %v228_v59 = vsel %vm226_vm3, %v625_v21, %v227_v50  ;;  %v437_v62 = vsel %vm435_vm5, %v625_v21, %v227_v50  ;;  %vm326_vm3 = vweird.f32 %v710_v41 }
  0x85   :  { %v232_v5 = vsel %vm225_vm9, %v228_v59, %v231_v61  ;;  %v441_v6 = vsel %vm434_vm10, %v437_v62, %v440_v0 }
  0x86   :  { %v233_v51 = vsel %vm223_vm12, nan, %v232_v5  ;;  %v442_v60 = vsel %vm223_vm12, nan, %v441_v6 }
  0x87   :  { %v337_v15 = vmul.f32 %v233_v51, %v129_v8  ;;  %v547_v16 = vmul.f32 %v442_v60, %v129_v8 }
  0x8a   :  { %v629_v7 = vpop.eup %628 }
  0x8b   :  { %v631_v9 = vpop.eup %630  ;;  %v333_v48 = vxor.u32 2147483648, %v629_v7 }
  0x8c   :  { %v330_v54 = vxor.u32 2147483648, %v631_v9 }
  0x8d   :  { %v334_v40 = vsel %vm332_vm13, %v333_v48, %v631_v9  ;;  %v544_v11 = vsel %vm542_vm14, %v333_v48, %v631_v9 }
  0x8e   :  { %v331_v12 = vsel %vm329_vm0, %v629_v7, %v330_v54  ;;  %v541_v13 = vsel %vm539_vm1, %v629_v7, %v330_v54 }
  0x8f   :  { %v335_v14 = vsel %vm328_vm15, %v331_v12, %v334_v40  ;;  %v545_v63 = vsel %vm538_vm2, %v541_v13, %v544_v11 }
  0x90   :  { %v336_v17 = vsel %vm326_vm3, nan, %v335_v14  ;;  %v546_v18 = vsel %vm326_vm3, nan, %v545_v63 }
  0x91   :  { %v338_v52 = vmul.f32 %v336_v17, %v130_v10  ;;  %v548_v19 = vmul.f32 %v546_v18, %v130_v10 }
  0x93   :  { %v553_v23 = vcombine.low %v337_v15, %v338_v52  ;;  %v561_v24 = vcombine.low %v547_v16, %v548_v19 }
  0x95   :  { %v555_v25 = vadd.f32 %v553_v23, %v549_v20  ;;  %v563_v26 = vadd.f32 %v561_v24, %v550_v22 }
  0x97   :  { %v556_v41 = vmax.f32 %v555_v25, 0.0  ;;  %v564_v27 = vmax.f32 %v563_v26, 0.0 }
  0x99   :  { %v557_v28 = vmin.f32 %v556_v41, 1.0  ;;  %v565_v29 = vmin.f32 %v564_v27, 1.0 }
  0x9b   :  { %558 = vst [vmem:[#allocation7] sm:$0xff] %v557_v28  ;;  %566 = vst [vmem:[#allocation7 + $0x8] sm:$0xff] %v565_v29 }
  0x9c   :  { %663 = shalt.err (!%p660_p9)
}
  0x9d   :  { %576 = dma.vmem_to_hbm [thread:$0]  %s574_s7, 256, %s814_s2, [#allocation6]  }
  0x9e   :  { %674 = dma.done.wait [#allocation6], 256  }
  0x9f   :  { %675 = vsyncadd [#allocation6], 4294967040 }
  0xa0   :  { %580 = vsyncpa [#allocation5], 1 }
  0xa1   :  { %581 = vsyncpa [#allocation6], 1 }

</bundles_post_ra>
